<compile_context>
chip_gen: v7x
topology: tpu7x:2x2x1
jax: 0.10.0
libtpu: 0.0.40
codegen_flags: <defaults>
</compile_context>

<pallas_src>
import jax
import jax.numpy as jnp
from jax.experimental import pallas as pl
from jax.experimental.pallas import tpu as pltpu

NEG_SLOPE = 0.01            # F.leaky_relu default
LN_EPS = 1e-5               # nn.LayerNorm default
NUM_RESIDUAL_BLOCKS = 4     # MiddleBlock = 2 ResNetBlocks = 4 ResidualBlocks


# ----------------------------- in-kernel helpers -----------------------------

def _layernorm(x, gamma, beta):
    # x: (T, C); normalize over channels.  Biased variance, eps=1e-5, f32 stats.
    mean = jnp.mean(x, axis=-1, keepdims=True)
    var = jnp.mean(jnp.square(x - mean), axis=-1, keepdims=True)
    return (x - mean) * jax.lax.rsqrt(var + LN_EPS) * gamma + beta


def _leaky_relu(x):
    return jnp.where(x >= 0, x, NEG_SLOPE * x)


# --------------------------------- kernel ------------------------------------

def _middle_block_kernel(x_ref, g_ref, b_ref, w_ref, o_ref):
    # x_ref : (1, T, C)  f32 block (one batch element)
    # g_ref : (N, 1, C)  f32 LayerNorm gammas      (N = 4 residual blocks)
    # b_ref : (N, 1, C)  f32 LayerNorm betas
    # w_ref : (N, 3C, C) bf16 tap-concatenated Conv1d(k=3) weights
    # o_ref : (1, T, C)  output block
    h = x_ref[0]                                             # (T, C) f32, stays in VMEM/vregs
    t, c = h.shape
    zero_row = jnp.zeros((1, c), jnp.float32)
    for i in range(g_ref.shape[0]):                          # statically unrolled (N = 4)
        z = _leaky_relu(_layernorm(h, g_ref[i], b_ref[i]))   # (T, C) f32
        # im2col over the 3 conv taps -> a single MXU matmul against (3C, C)
        zp = jnp.concatenate([zero_row, z, zero_row], axis=0)                 # (T+2, C)
        z3 = jnp.concatenate([zp[0:t], zp[1:t + 1], zp[2:t + 2]], axis=-1)    # (T, 3C)
        h = h + jnp.dot(z3.astype(jnp.bfloat16), w_ref[i],
                        preferred_element_type=jnp.float32)  # bf16 MXU, f32 accum
    o_ref[0] = h.astype(o_ref.dtype)


# ------------------------------ pallas wrapper --------------------------------

def middle_block_btc(x_btc, params):
    """Fused MiddleBlock on (B, T, C) activations."""
    B, T, C = x_btc.shape
    gamma, beta, wcat = params["gamma"], params["beta"], params["wcat"]
    return pl.pallas_call(
        _middle_block_kernel,
        grid=(B,),
        in_specs=[
            pl.BlockSpec((1, T, C), lambda b: (b, 0, 0)),
            pl.BlockSpec(gamma.shape, lambda b: (0, 0, 0)),
            pl.BlockSpec(beta.shape, lambda b: (0, 0, 0)),
            pl.BlockSpec(wcat.shape, lambda b: (0, 0, 0)),
        ],
        out_specs=pl.BlockSpec((1, T, C), lambda b: (b, 0, 0)),
        out_shape=jax.ShapeDtypeStruct((B, T, C), x_btc.dtype),
        # "parallel" lets v7x split the batch across its 2 TensorCores; on
        # v5e/v6e the B-step serial grid overhead is negligible (<1 us).
        compiler_params=pltpu.CompilerParams(dimension_semantics=("parallel",)),
    )(x_btc, gamma, beta, wcat)


def middle_block_forward(params, x_bct):
    """PyTorch layout at the boundary: x (B, C, T) -> y (B, C, T)."""
    # TODO(synk): fold these boundary transposes into the kernel once an
    # in-kernel (C,T)<->(T,C) transpose at non-native tile shapes is validated.
    y_btc = middle_block_btc(jnp.transpose(x_bct, (0, 2, 1)), params)
    return jnp.transpose(y_btc, (0, 2, 1))


# ------------------------------ parameter setup -------------------------------

def init_middle_block_params(key, channels, num_blocks=NUM_RESIDUAL_BLOCKS):
    gammas, betas, wcats = [], [], []
    for i in range(num_blocks):
        kg, kb, kw = jax.random.split(jax.random.fold_in(key, i), 3)
        gammas.append(1.0 + 0.1 * jax.random.normal(kg, (1, channels), jnp.float32))
        betas.append(0.01 * jax.random.normal(kb, (1, channels), jnp.float32))
        # Conv weight stored as (K=3, Cin, Cout) then tap-concatenated host-side
        # to (3*Cin, Cout).  From a PyTorch Conv1d weight Wt of shape
        # (Cout, Cin, K) this is  Wt.transpose(2, 1, 0).reshape(3*Cin, Cout).
        w = 0.1 * jax.random.normal(kw, (3, channels, channels), jnp.float32)
        wcats.append(w.reshape(3 * channels, channels))
    return {
        "gamma": jnp.stack(gammas),                       # (N, 1, C)  f32
        "beta": jnp.stack(betas),                         # (N, 1, C)  f32
        "wcat": jnp.stack(wcats).astype(jnp.bfloat16),    # (N, 3C, C) bf16
    }


# ------------------------- pure-JAX reference (check) --------------------------

def middle_block_reference(params, x_bct):
    h = jnp.transpose(x_bct, (0, 2, 1)).astype(jnp.float32)   # (B, T, C)
    T = h.shape[1]
    for i in range(params["gamma"].shape[0]):
        g = params["gamma"][i]
        b = params["beta"][i]
        mean = jnp.mean(h, axis=-1, keepdims=True)
        var = jnp.mean(jnp.square(h - mean), axis=-1, keepdims=True)
        z = (h - mean) * jax.lax.rsqrt(var + LN_EPS) * g + b
        z = jnp.where(z >= 0, z, NEG_SLOPE * z)
        zp = jnp.pad(z, ((0, 0), (1, 1), (0, 0)))
        z3 = jnp.concatenate([zp[:, 0:T], zp[:, 1:T + 1], zp[:, 2:T + 2]], axis=-1)
        # mirror the kernel's bf16 operand quantization (f32 accumulation)
        z3 = z3.astype(jnp.bfloat16).astype(jnp.float32)
        w = params["wcat"][i].astype(jnp.float32)
        h = h + jnp.einsum("btk,ko->bto", z3, w)
    return jnp.transpose(h, (0, 2, 1))


# ----------------------------------- main --------------------------------------

if __name__ == "__main__":
    key = jax.random.PRNGKey(0)
    kp, kx = jax.random.split(key)

    B, C, T = 2, 16, 32          # MiddleBlock(channels=16) on (B, C, T) input
    params = init_middle_block_params(kp, channels=C)
    x = jax.random.normal(kx, (B, C, T), jnp.float32)

    fwd = jax.jit(middle_block_forward)
    y = fwd(params, x)
    jax.block_until_ready(y)

    assert y.shape == (B, C, T), y.shape
    assert bool(jnp.all(jnp.isfinite(y)))

    y_ref = middle_block_reference(params, x)
    max_err = float(jnp.max(jnp.abs(y - y_ref)))
    assert bool(jnp.allclose(y, y_ref, rtol=5e-2, atol=5e-2)), max_err

    print("KERNEL_OK")
</pallas_src>

<mosaic_0001>
module attributes {stable_mosaic.version = 11 : i64} {
  func.func @_middle_block_kernel(%arg0: i32, %arg1: memref<1x32x16xf32, #tpu.memory_space<vmem>>, %arg2: memref<4x1x16xf32, #tpu.memory_space<vmem>>, %arg3: memref<4x1x16xf32, #tpu.memory_space<vmem>>, %arg4: memref<4x48x16xbf16, #tpu.memory_space<vmem>>, %arg5: memref<1x32x16xf32, #tpu.memory_space<vmem>>) attributes {dimension_semantics = [#tpu.dimension_semantics<parallel>], iteration_bounds = array<i64: 2>, scalar_prefetch = 0 : i64, scratch_operands = 0 : i64, tpu.core_type = #tpu.core_type<tc>, window_params = [{transform_indices = @transform_0, window_bounds = array<i64: 1, 32, 16>}, {pipeline_mode = #tpu.pipeline_mode<synchronous>, transform_indices = @transform_1, window_bounds = array<i64: 4, 1, 16>}, {pipeline_mode = #tpu.pipeline_mode<synchronous>, transform_indices = @transform_2, window_bounds = array<i64: 4, 1, 16>}, {pipeline_mode = #tpu.pipeline_mode<synchronous>, transform_indices = @transform_3, window_bounds = array<i64: 4, 48, 16>}, {transform_indices = @transform_4, window_bounds = array<i64: 1, 32, 16>}]} {
    %c0 = arith.constant 0 : index
    %c0_0 = arith.constant 0 : index
    %c0_1 = arith.constant 0 : index
    %0 = vector.load %arg1[%c0, %c0_0, %c0_1] : memref<1x32x16xf32, #tpu.memory_space<vmem>>, vector<1x32x16xf32>
    %1 = vector.shape_cast %0 : vector<1x32x16xf32> to vector<32x16xf32>
    %cst = arith.constant 0.000000e+00 : f32
    %2 = vector.broadcast %cst : f32 to vector<1x16xf32>
    %c0_2 = arith.constant 0 : index
    %c0_3 = arith.constant 0 : index
    %c0_4 = arith.constant 0 : index
    %3 = vector.load %arg2[%c0_2, %c0_3, %c0_4] : memref<4x1x16xf32, #tpu.memory_space<vmem>>, vector<1x1x16xf32>
    %4 = vector.shape_cast %3 : vector<1x1x16xf32> to vector<1x16xf32>
    %c0_5 = arith.constant 0 : index
    %c0_6 = arith.constant 0 : index
    %c0_7 = arith.constant 0 : index
    %5 = vector.load %arg3[%c0_5, %c0_6, %c0_7] : memref<4x1x16xf32, #tpu.memory_space<vmem>>, vector<1x1x16xf32>
    %6 = vector.shape_cast %5 : vector<1x1x16xf32> to vector<1x16xf32>
    %cst_8 = arith.constant dense<0.000000e+00> : vector<32xf32>
    %7 = vector.multi_reduction <add>, %1, %cst_8 [1] : vector<32x16xf32> to vector<32xf32>
    %8 = vector.shape_cast %7 : vector<32xf32> to vector<32x1xf32>
    %cst_9 = arith.constant 1.600000e+01 : f32
    %9 = vector.broadcast %cst_9 : f32 to vector<32x1xf32>
    %10 = arith.divf %8, %9 : vector<32x1xf32>
    %11 = vector.broadcast %10 : vector<32x1xf32> to vector<32x16xf32>
    %12 = arith.subf %1, %11 : vector<32x16xf32>
    %13 = arith.mulf %12, %12 : vector<32x16xf32>
    %cst_10 = arith.constant dense<0.000000e+00> : vector<32xf32>
    %14 = vector.multi_reduction <add>, %13, %cst_10 [1] : vector<32x16xf32> to vector<32xf32>
    %15 = vector.shape_cast %14 : vector<32xf32> to vector<32x1xf32>
    %cst_11 = arith.constant 1.600000e+01 : f32
    %16 = vector.broadcast %cst_11 : f32 to vector<32x1xf32>
    %17 = arith.divf %15, %16 : vector<32x1xf32>
    %18 = vector.broadcast %10 : vector<32x1xf32> to vector<32x16xf32>
    %19 = arith.subf %1, %18 : vector<32x16xf32>
    %cst_12 = arith.constant 9.99999974E-6 : f32
    %20 = vector.broadcast %cst_12 : f32 to vector<32x1xf32>
    %21 = arith.addf %17, %20 : vector<32x1xf32>
    %22 = math.rsqrt %21 : vector<32x1xf32>
    %23 = vector.broadcast %22 : vector<32x1xf32> to vector<32x16xf32>
    %24 = arith.mulf %19, %23 : vector<32x16xf32>
    %25 = vector.broadcast %4 : vector<1x16xf32> to vector<32x16xf32>
    %26 = arith.mulf %24, %25 : vector<32x16xf32>
    %27 = vector.broadcast %6 : vector<1x16xf32> to vector<32x16xf32>
    %28 = arith.addf %26, %27 : vector<32x16xf32>
    %cst_13 = arith.constant 0.000000e+00 : f32
    %29 = vector.broadcast %cst_13 : f32 to vector<32x16xf32>
    %30 = arith.cmpf oge, %28, %29 : vector<32x16xf32>
    %cst_14 = arith.constant 0.00999999977 : f32
    %31 = vector.broadcast %cst_14 : f32 to vector<32x16xf32>
    %32 = arith.mulf %31, %28 : vector<32x16xf32>
    %33 = arith.select %30, %28, %32 : vector<32x16xi1>, vector<32x16xf32>
    %34 = tpu.concatenate %2, %33, %2 in 0 : vector<1x16xf32>, vector<32x16xf32>, vector<1x16xf32> -> vector<34x16xf32>
    %35 = vector.extract_strided_slice %34 {offsets = [0, 0], sizes = [32, 16], strides = [1, 1]} : vector<34x16xf32> to vector<32x16xf32>
    %36 = vector.extract_strided_slice %34 {offsets = [1, 0], sizes = [32, 16], strides = [1, 1]} : vector<34x16xf32> to vector<32x16xf32>
    %37 = vector.extract_strided_slice %34 {offsets = [2, 0], sizes = [32, 16], strides = [1, 1]} : vector<34x16xf32> to vector<32x16xf32>
    %38 = tpu.concatenate %35, %36, %37 in 1 : vector<32x16xf32>, vector<32x16xf32>, vector<32x16xf32> -> vector<32x48xf32>
    %39 = arith.truncf %38 : vector<32x48xf32> to vector<32x48xbf16>
    %c0_15 = arith.constant 0 : index
    %c0_16 = arith.constant 0 : index
    %c0_17 = arith.constant 0 : index
    %40 = vector.load %arg4[%c0_15, %c0_16, %c0_17] : memref<4x48x16xbf16, #tpu.memory_space<vmem>>, vector<1x48x16xbf16>
    %41 = vector.shape_cast %40 : vector<1x48x16xbf16> to vector<48x16xbf16>
    %cst_18 = arith.constant dense<0.000000e+00> : vector<32x16xf32>
    %42 = tpu.matmul %39, %41, %cst_18 {dimension_numbers = #tpu.dot_dimension_numbers<[1], [0], [0], [1], [0, 0, 1, 1], [], []>} : vector<32x48xbf16>, vector<48x16xbf16>, vector<32x16xf32> -> vector<32x16xf32>
    %43 = arith.addf %1, %42 : vector<32x16xf32>
    %c1 = arith.constant 1 : index
    %c0_19 = arith.constant 0 : index
    %c0_20 = arith.constant 0 : index
    %44 = vector.load %arg2[%c1, %c0_19, %c0_20] : memref<4x1x16xf32, #tpu.memory_space<vmem>>, vector<1x1x16xf32>
    %45 = vector.shape_cast %44 : vector<1x1x16xf32> to vector<1x16xf32>
    %c1_21 = arith.constant 1 : index
    %c0_22 = arith.constant 0 : index
    %c0_23 = arith.constant 0 : index
    %46 = vector.load %arg3[%c1_21, %c0_22, %c0_23] : memref<4x1x16xf32, #tpu.memory_space<vmem>>, vector<1x1x16xf32>
    %47 = vector.shape_cast %46 : vector<1x1x16xf32> to vector<1x16xf32>
    %cst_24 = arith.constant dense<0.000000e+00> : vector<32xf32>
    %48 = vector.multi_reduction <add>, %43, %cst_24 [1] : vector<32x16xf32> to vector<32xf32>
    %49 = vector.shape_cast %48 : vector<32xf32> to vector<32x1xf32>
    %cst_25 = arith.constant 1.600000e+01 : f32
    %50 = vector.broadcast %cst_25 : f32 to vector<32x1xf32>
    %51 = arith.divf %49, %50 : vector<32x1xf32>
    %52 = vector.broadcast %51 : vector<32x1xf32> to vector<32x16xf32>
    %53 = arith.subf %43, %52 : vector<32x16xf32>
    %54 = arith.mulf %53, %53 : vector<32x16xf32>
    %cst_26 = arith.constant dense<0.000000e+00> : vector<32xf32>
    %55 = vector.multi_reduction <add>, %54, %cst_26 [1] : vector<32x16xf32> to vector<32xf32>
    %56 = vector.shape_cast %55 : vector<32xf32> to vector<32x1xf32>
    %cst_27 = arith.constant 1.600000e+01 : f32
    %57 = vector.broadcast %cst_27 : f32 to vector<32x1xf32>
    %58 = arith.divf %56, %57 : vector<32x1xf32>
    %59 = vector.broadcast %51 : vector<32x1xf32> to vector<32x16xf32>
    %60 = arith.subf %43, %59 : vector<32x16xf32>
    %cst_28 = arith.constant 9.99999974E-6 : f32
    %61 = vector.broadcast %cst_28 : f32 to vector<32x1xf32>
    %62 = arith.addf %58, %61 : vector<32x1xf32>
    %63 = math.rsqrt %62 : vector<32x1xf32>
    %64 = vector.broadcast %63 : vector<32x1xf32> to vector<32x16xf32>
    %65 = arith.mulf %60, %64 : vector<32x16xf32>
    %66 = vector.broadcast %45 : vector<1x16xf32> to vector<32x16xf32>
    %67 = arith.mulf %65, %66 : vector<32x16xf32>
    %68 = vector.broadcast %47 : vector<1x16xf32> to vector<32x16xf32>
    %69 = arith.addf %67, %68 : vector<32x16xf32>
    %cst_29 = arith.constant 0.000000e+00 : f32
    %70 = vector.broadcast %cst_29 : f32 to vector<32x16xf32>
    %71 = arith.cmpf oge, %69, %70 : vector<32x16xf32>
    %cst_30 = arith.constant 0.00999999977 : f32
    %72 = vector.broadcast %cst_30 : f32 to vector<32x16xf32>
    %73 = arith.mulf %72, %69 : vector<32x16xf32>
    %74 = arith.select %71, %69, %73 : vector<32x16xi1>, vector<32x16xf32>
    %75 = tpu.concatenate %2, %74, %2 in 0 : vector<1x16xf32>, vector<32x16xf32>, vector<1x16xf32> -> vector<34x16xf32>
    %76 = vector.extract_strided_slice %75 {offsets = [0, 0], sizes = [32, 16], strides = [1, 1]} : vector<34x16xf32> to vector<32x16xf32>
    %77 = vector.extract_strided_slice %75 {offsets = [1, 0], sizes = [32, 16], strides = [1, 1]} : vector<34x16xf32> to vector<32x16xf32>
    %78 = vector.extract_strided_slice %75 {offsets = [2, 0], sizes = [32, 16], strides = [1, 1]} : vector<34x16xf32> to vector<32x16xf32>
    %79 = tpu.concatenate %76, %77, %78 in 1 : vector<32x16xf32>, vector<32x16xf32>, vector<32x16xf32> -> vector<32x48xf32>
    %80 = arith.truncf %79 : vector<32x48xf32> to vector<32x48xbf16>
    %c1_31 = arith.constant 1 : index
    %c0_32 = arith.constant 0 : index
    %c0_33 = arith.constant 0 : index
    %81 = vector.load %arg4[%c1_31, %c0_32, %c0_33] : memref<4x48x16xbf16, #tpu.memory_space<vmem>>, vector<1x48x16xbf16>
    %82 = vector.shape_cast %81 : vector<1x48x16xbf16> to vector<48x16xbf16>
    %cst_34 = arith.constant dense<0.000000e+00> : vector<32x16xf32>
    %83 = tpu.matmul %80, %82, %cst_34 {dimension_numbers = #tpu.dot_dimension_numbers<[1], [0], [0], [1], [0, 0, 1, 1], [], []>} : vector<32x48xbf16>, vector<48x16xbf16>, vector<32x16xf32> -> vector<32x16xf32>
    %84 = arith.addf %43, %83 : vector<32x16xf32>
    %c2 = arith.constant 2 : index
    %c0_35 = arith.constant 0 : index
    %c0_36 = arith.constant 0 : index
    %85 = vector.load %arg2[%c2, %c0_35, %c0_36] : memref<4x1x16xf32, #tpu.memory_space<vmem>>, vector<1x1x16xf32>
    %86 = vector.shape_cast %85 : vector<1x1x16xf32> to vector<1x16xf32>
    %c2_37 = arith.constant 2 : index
    %c0_38 = arith.constant 0 : index
    %c0_39 = arith.constant 0 : index
    %87 = vector.load %arg3[%c2_37, %c0_38, %c0_39] : memref<4x1x16xf32, #tpu.memory_space<vmem>>, vector<1x1x16xf32>
    %88 = vector.shape_cast %87 : vector<1x1x16xf32> to vector<1x16xf32>
    %cst_40 = arith.constant dense<0.000000e+00> : vector<32xf32>
    %89 = vector.multi_reduction <add>, %84, %cst_40 [1] : vector<32x16xf32> to vector<32xf32>
    %90 = vector.shape_cast %89 : vector<32xf32> to vector<32x1xf32>
    %cst_41 = arith.constant 1.600000e+01 : f32
    %91 = vector.broadcast %cst_41 : f32 to vector<32x1xf32>
    %92 = arith.divf %90, %91 : vector<32x1xf32>
    %93 = vector.broadcast %92 : vector<32x1xf32> to vector<32x16xf32>
    %94 = arith.subf %84, %93 : vector<32x16xf32>
    %95 = arith.mulf %94, %94 : vector<32x16xf32>
    %cst_42 = arith.constant dense<0.000000e+00> : vector<32xf32>
    %96 = vector.multi_reduction <add>, %95, %cst_42 [1] : vector<32x16xf32> to vector<32xf32>
    %97 = vector.shape_cast %96 : vector<32xf32> to vector<32x1xf32>
    %cst_43 = arith.constant 1.600000e+01 : f32
    %98 = vector.broadcast %cst_43 : f32 to vector<32x1xf32>
    %99 = arith.divf %97, %98 : vector<32x1xf32>
    %100 = vector.broadcast %92 : vector<32x1xf32> to vector<32x16xf32>
    %101 = arith.subf %84, %100 : vector<32x16xf32>
    %cst_44 = arith.constant 9.99999974E-6 : f32
    %102 = vector.broadcast %cst_44 : f32 to vector<32x1xf32>
    %103 = arith.addf %99, %102 : vector<32x1xf32>
    %104 = math.rsqrt %103 : vector<32x1xf32>
    %105 = vector.broadcast %104 : vector<32x1xf32> to vector<32x16xf32>
    %106 = arith.mulf %101, %105 : vector<32x16xf32>
    %107 = vector.broadcast %86 : vector<1x16xf32> to vector<32x16xf32>
    %108 = arith.mulf %106, %107 : vector<32x16xf32>
    %109 = vector.broadcast %88 : vector<1x16xf32> to vector<32x16xf32>
    %110 = arith.addf %108, %109 : vector<32x16xf32>
    %cst_45 = arith.constant 0.000000e+00 : f32
    %111 = vector.broadcast %cst_45 : f32 to vector<32x16xf32>
    %112 = arith.cmpf oge, %110, %111 : vector<32x16xf32>
    %cst_46 = arith.constant 0.00999999977 : f32
    %113 = vector.broadcast %cst_46 : f32 to vector<32x16xf32>
    %114 = arith.mulf %113, %110 : vector<32x16xf32>
    %115 = arith.select %112, %110, %114 : vector<32x16xi1>, vector<32x16xf32>
    %116 = tpu.concatenate %2, %115, %2 in 0 : vector<1x16xf32>, vector<32x16xf32>, vector<1x16xf32> -> vector<34x16xf32>
    %117 = vector.extract_strided_slice %116 {offsets = [0, 0], sizes = [32, 16], strides = [1, 1]} : vector<34x16xf32> to vector<32x16xf32>
    %118 = vector.extract_strided_slice %116 {offsets = [1, 0], sizes = [32, 16], strides = [1, 1]} : vector<34x16xf32> to vector<32x16xf32>
    %119 = vector.extract_strided_slice %116 {offsets = [2, 0], sizes = [32, 16], strides = [1, 1]} : vector<34x16xf32> to vector<32x16xf32>
    %120 = tpu.concatenate %117, %118, %119 in 1 : vector<32x16xf32>, vector<32x16xf32>, vector<32x16xf32> -> vector<32x48xf32>
    %121 = arith.truncf %120 : vector<32x48xf32> to vector<32x48xbf16>
    %c2_47 = arith.constant 2 : index
    %c0_48 = arith.constant 0 : index
    %c0_49 = arith.constant 0 : index
    %122 = vector.load %arg4[%c2_47, %c0_48, %c0_49] : memref<4x48x16xbf16, #tpu.memory_space<vmem>>, vector<1x48x16xbf16>
    %123 = vector.shape_cast %122 : vector<1x48x16xbf16> to vector<48x16xbf16>
    %cst_50 = arith.constant dense<0.000000e+00> : vector<32x16xf32>
    %124 = tpu.matmul %121, %123, %cst_50 {dimension_numbers = #tpu.dot_dimension_numbers<[1], [0], [0], [1], [0, 0, 1, 1], [], []>} : vector<32x48xbf16>, vector<48x16xbf16>, vector<32x16xf32> -> vector<32x16xf32>
    %125 = arith.addf %84, %124 : vector<32x16xf32>
    %c3 = arith.constant 3 : index
    %c0_51 = arith.constant 0 : index
    %c0_52 = arith.constant 0 : index
    %126 = vector.load %arg2[%c3, %c0_51, %c0_52] : memref<4x1x16xf32, #tpu.memory_space<vmem>>, vector<1x1x16xf32>
    %127 = vector.shape_cast %126 : vector<1x1x16xf32> to vector<1x16xf32>
    %c3_53 = arith.constant 3 : index
    %c0_54 = arith.constant 0 : index
    %c0_55 = arith.constant 0 : index
    %128 = vector.load %arg3[%c3_53, %c0_54, %c0_55] : memref<4x1x16xf32, #tpu.memory_space<vmem>>, vector<1x1x16xf32>
    %129 = vector.shape_cast %128 : vector<1x1x16xf32> to vector<1x16xf32>
    %cst_56 = arith.constant dense<0.000000e+00> : vector<32xf32>
    %130 = vector.multi_reduction <add>, %125, %cst_56 [1] : vector<32x16xf32> to vector<32xf32>
    %131 = vector.shape_cast %130 : vector<32xf32> to vector<32x1xf32>
    %cst_57 = arith.constant 1.600000e+01 : f32
    %132 = vector.broadcast %cst_57 : f32 to vector<32x1xf32>
    %133 = arith.divf %131, %132 : vector<32x1xf32>
    %134 = vector.broadcast %133 : vector<32x1xf32> to vector<32x16xf32>
    %135 = arith.subf %125, %134 : vector<32x16xf32>
    %136 = arith.mulf %135, %135 : vector<32x16xf32>
    %cst_58 = arith.constant dense<0.000000e+00> : vector<32xf32>
    %137 = vector.multi_reduction <add>, %136, %cst_58 [1] : vector<32x16xf32> to vector<32xf32>
    %138 = vector.shape_cast %137 : vector<32xf32> to vector<32x1xf32>
    %cst_59 = arith.constant 1.600000e+01 : f32
    %139 = vector.broadcast %cst_59 : f32 to vector<32x1xf32>
    %140 = arith.divf %138, %139 : vector<32x1xf32>
    %141 = vector.broadcast %133 : vector<32x1xf32> to vector<32x16xf32>
    %142 = arith.subf %125, %141 : vector<32x16xf32>
    %cst_60 = arith.constant 9.99999974E-6 : f32
    %143 = vector.broadcast %cst_60 : f32 to vector<32x1xf32>
    %144 = arith.addf %140, %143 : vector<32x1xf32>
    %145 = math.rsqrt %144 : vector<32x1xf32>
    %146 = vector.broadcast %145 : vector<32x1xf32> to vector<32x16xf32>
    %147 = arith.mulf %142, %146 : vector<32x16xf32>
    %148 = vector.broadcast %127 : vector<1x16xf32> to vector<32x16xf32>
    %149 = arith.mulf %147, %148 : vector<32x16xf32>
    %150 = vector.broadcast %129 : vector<1x16xf32> to vector<32x16xf32>
    %151 = arith.addf %149, %150 : vector<32x16xf32>
    %cst_61 = arith.constant 0.000000e+00 : f32
    %152 = vector.broadcast %cst_61 : f32 to vector<32x16xf32>
    %153 = arith.cmpf oge, %151, %152 : vector<32x16xf32>
    %cst_62 = arith.constant 0.00999999977 : f32
    %154 = vector.broadcast %cst_62 : f32 to vector<32x16xf32>
    %155 = arith.mulf %154, %151 : vector<32x16xf32>
    %156 = arith.select %153, %151, %155 : vector<32x16xi1>, vector<32x16xf32>
    %157 = tpu.concatenate %2, %156, %2 in 0 : vector<1x16xf32>, vector<32x16xf32>, vector<1x16xf32> -> vector<34x16xf32>
    %158 = vector.extract_strided_slice %157 {offsets = [0, 0], sizes = [32, 16], strides = [1, 1]} : vector<34x16xf32> to vector<32x16xf32>
    %159 = vector.extract_strided_slice %157 {offsets = [1, 0], sizes = [32, 16], strides = [1, 1]} : vector<34x16xf32> to vector<32x16xf32>
    %160 = vector.extract_strided_slice %157 {offsets = [2, 0], sizes = [32, 16], strides = [1, 1]} : vector<34x16xf32> to vector<32x16xf32>
    %161 = tpu.concatenate %158, %159, %160 in 1 : vector<32x16xf32>, vector<32x16xf32>, vector<32x16xf32> -> vector<32x48xf32>
    %162 = arith.truncf %161 : vector<32x48xf32> to vector<32x48xbf16>
    %c3_63 = arith.constant 3 : index
    %c0_64 = arith.constant 0 : index
    %c0_65 = arith.constant 0 : index
    %163 = vector.load %arg4[%c3_63, %c0_64, %c0_65] : memref<4x48x16xbf16, #tpu.memory_space<vmem>>, vector<1x48x16xbf16>
    %164 = vector.shape_cast %163 : vector<1x48x16xbf16> to vector<48x16xbf16>
    %cst_66 = arith.constant dense<0.000000e+00> : vector<32x16xf32>
    %165 = tpu.matmul %162, %164, %cst_66 {dimension_numbers = #tpu.dot_dimension_numbers<[1], [0], [0], [1], [0, 0, 1, 1], [], []>} : vector<32x48xbf16>, vector<48x16xbf16>, vector<32x16xf32> -> vector<32x16xf32>
    %166 = arith.addf %125, %165 : vector<32x16xf32>
    %c0_67 = arith.constant 0 : index
    %c0_68 = arith.constant 0 : index
    %c0_69 = arith.constant 0 : index
    %167 = vector.load %arg5[%c0_67, %c0_68, %c0_69] : memref<1x32x16xf32, #tpu.memory_space<vmem>>, vector<1x32x16xf32>
    %168 = vector.shape_cast %167 : vector<1x32x16xf32> to vector<32x16xf32>
    %169 = vector.shape_cast %166 : vector<32x16xf32> to vector<1x32x16xf32>
    tpu.vector_store %arg5[%c0_67, %c0_68, %c0_69], %169 {strides = array<i32>} : memref<1x32x16xf32, #tpu.memory_space<vmem>>, vector<1x32x16xf32>,
    return
  }
  func.func @transform_0(%arg0: i32) -> (i32, i32, i32) {
    %c0_i32 = arith.constant 0 : i32
    %c0_i32_0 = arith.constant 0 : i32
    %c0_i32_1 = arith.constant 0 : i32
    return %arg0, %c0_i32, %c0_i32_0 : i32, i32, i32
  }
  func.func @transform_1(%arg0: i32) -> (i32, i32, i32) {
    %c0_i32 = arith.constant 0 : i32
    %c0_i32_0 = arith.constant 0 : i32
    %c0_i32_1 = arith.constant 0 : i32
    %c0_i32_2 = arith.constant 0 : i32
    return %c0_i32, %c0_i32_0, %c0_i32_1 : i32, i32, i32
  }
  func.func @transform_2(%arg0: i32) -> (i32, i32, i32) {
    %c0_i32 = arith.constant 0 : i32
    %c0_i32_0 = arith.constant 0 : i32
    %c0_i32_1 = arith.constant 0 : i32
    %c0_i32_2 = arith.constant 0 : i32
    return %c0_i32, %c0_i32_0, %c0_i32_1 : i32, i32, i32
  }
  func.func @transform_3(%arg0: i32) -> (i32, i32, i32) {
    %c0_i32 = arith.constant 0 : i32
    %c0_i32_0 = arith.constant 0 : i32
    %c0_i32_1 = arith.constant 0 : i32
    %c0_i32_2 = arith.constant 0 : i32
    return %c0_i32, %c0_i32_0, %c0_i32_1 : i32, i32, i32
  }
  func.func @transform_4(%arg0: i32) -> (i32, i32, i32) {
    %c0_i32 = arith.constant 0 : i32
    %c0_i32_0 = arith.constant 0 : i32
    %c0_i32_1 = arith.constant 0 : i32
    return %arg0, %c0_i32, %c0_i32_0 : i32, i32, i32
  }
}

</mosaic_0001>

<bundles_post_ra>
// kernel: middle_block_forward.1
= control target key start
LH: loop header
LB: loop body
LE: loop exit
PB: predicated region body
PF: predicated region fallthrough
CT: control target
= control target key end

     0   :  { %s1536_s15 = smov 0   ;;  %s1844_s0 = inlined_call_operand.vmem [shape: f32[2,32,16], index: 0, kind: input, shape index: {}]   ;;  %s1845_s1 = inlined_call_operand.vmem [shape: f32[4,1,16], index: 1, kind: input, shape index: {}]   ;;  %s1846_s2 = inlined_call_operand.vmem [shape: f32[4,1,16], index: 2, kind: input, shape index: {}]   ;;  %s1847_s3 = inlined_call_operand.vmem [shape: bf16[4,48,16], index: 3, kind: input, shape index: {}]   ;;  %s1848_s4 = inlined_call_operand.vmem [shape: f32[2,32,16], index: 4, kind: output, shape index: {}]  }
   0x1 LB: > { %s1242_s16 = sadd.s32 4294967295, %s1507_s15   ;;  %p1246_p0 = scmp.ge.s32.totalorder %s1507_s15, 1  ;;  %s1507_s15 = sphi %s1536_s15, %s14_s15  }
   0x2   : > { %p162_p1 = scmp.lt.s32.totalorder %s1507_s15, 3 }
   0x4   : > { %p163_p2 = pnand %p1246_p0, %p162_p1 }
   0x5   : > { %p188_p3 = scmp.lt.s32.totalorder (!%p163_p2), %s1242_s16, 1  ;;  %vm205_vm0 = vcmask (!%p163_p2), 130048   ;;  %v1251_v41 = vld [vmem:[%s1845_s1] ss:$0 sm:$0xff] (!%p163_p2)  ;;  %vm295_vm3 = vcmask (!%p163_p2), 1040384   ;;  %vm312_vm6 = vcmask (!%p163_p2), 1046528  }
   0x6   : > { %166 = sbr.rel (%p163_p2) target bundleno = 2720 (0xaa0), region = 36  ;;  %v1252_v43 = vld [vmem:[%s1846_s2] ss:$0 sm:$0xff] (!%p163_p2)  ;;  %vm334_vm7 = vcmask (!%p163_p2), 1045504   ;;  %s1509_s5 = smov (!%p163_p2), 16   ;;  %vm360_vm8 = vcmask (!%p163_p2), 261120  }
   0x7   : > { %s1510_s6 = smov (!%p163_p2), 32   ;;  %vm391_vm9 = vcmask (!%p163_p2), 392192  }
   0xd   : > { %s1850_s16 = smov (!%p188_p3, %s1242_s16), 1 }
   0xe   : > { %s1305_s17 = sshll.u32 %s1850_s16, 5 }
   0xf   : > { %s192_s20 = scalar_lea.vmem %s1844_s0, %s1305_s17  ;;  %s197_s19 = scalar_lea.vmem %s1848_s4, %s1305_s17 }
  0x10   : > { %v1552_v0 = vld [vmem:[%s192_s20] sm:$0xff]  ;;  %v1554_v1 = vld [vmem:[%s192_s20 + $0x10] sm:$0xff]  ;;  %v1556_v2 = vld [vmem:[%s192_s20 + $0x8] sm:$0xff] }
  0x11   : > { %v206_v3 = vsel %vm205_vm0, %v1552_v0, 0.0  ;;  %v212_v4 = vsel %vm205_vm0, %v1554_v1, 0.0  ;;  %v1562_v5 = vld [vmem:[%s192_s20 + $0x18] sm:$0xff]  ;;  %v209_v6 = vsel %vm205_vm0, %v1556_v2, 0.0 }
  0x12   : > { %207 = vadd.xlane.f32.xlu0 %v206_v3  ;;  %213 = vadd.xlane.f32.xlu1 %v212_v4  ;;  %v215_v7 = vsel %vm205_vm0, %v1562_v5, 0.0  ;;  %v1457_v3 = vld [vmem:[%s1847_s3] sm:$0xff]  }
  0x13   : > { %1327 = vmatprep.subr.bf16.mxu0 %v1457_v3 }
  0x14   : > { %1328 = vmatpush3.bf16.msra.mxu0 %v1457_v3 }
  0x16   : > { %210 = vadd.xlane.f32.xlu0 %v209_v6  ;;  %216 = vadd.xlane.f32.xlu1 %v215_v7 }
  0x9f   : > { %v208_v8 = vpop.xlane.xlu0 %207  ;;  %v214_v9 = vpop.xlane.xlu1 %213 }
  0xa0   : > { %v219_v10 = vmul.f32 0.0625, %v208_v8  ;;  %v221_v11 = vmul.f32 0.0625, %v214_v9 }
  0xa2   : > { %v223_v12 = vsub.f32 %v1552_v0, %v219_v10  ;;  %v225_v13 = vsub.f32 %v1554_v1, %v221_v11 }
  0xa3   : > { %v211_v14 = vpop.xlane.xlu0 %210  ;;  %v217_v15 = vpop.xlane.xlu1 %216 }
  0xa4   : > { %v220_v16 = vmul.f32 0.0625, %v211_v14  ;;  %v222_v17 = vmul.f32 0.0625, %v217_v15  ;;  %v227_v18 = vmul.f32 %v223_v12, %v223_v12  ;;  %v229_v19 = vmul.f32 %v225_v13, %v225_v13  ;;  %v1458_v15 = vld [vmem:[%s1847_s3 + $0x8] sm:$0xff]  }
  0xa5   : > { %1329 = vmatprep.subr.bf16.mxu0 %v1458_v15 }
  0xa6   : > { %v224_v20 = vsub.f32 %v1556_v2, %v220_v16  ;;  %v226_v21 = vsub.f32 %v1562_v5, %v222_v17  ;;  %v231_v22 = vsel %vm205_vm0, %v227_v18, 0.0  ;;  %v237_v23 = vsel %vm205_vm0, %v229_v19, 0.0  ;;  %1330 = vmatpush3.bf16.msra.mxu0 %v1458_v15 }
  0xa7   : > { %232 = vadd.xlane.f32.xlu0 %v231_v22 }
  0xa8   : > { %v228_v24 = vmul.f32 %v224_v20, %v224_v20  ;;  %v230_v25 = vmul.f32 %v226_v21, %v226_v21 }
  0xaa   : > { %v234_v26 = vsel %vm205_vm0, %v228_v24, 0.0  ;;  %v240_v27 = vsel %vm205_vm0, %v230_v25, 0.0 }
  0xab   : > { %238 = vadd.xlane.f32.xlu0 %v237_v23  ;;  %235 = vadd.xlane.f32.xlu1 %v234_v26 }
  0xaf   : > { %241 = vadd.xlane.f32.xlu1 %v240_v27  ;;  %v1459_v27 = vld [vmem:[%s1847_s3 + $0x10] sm:$0xff]  }
  0xb0   : > { %1331 = vmatprep.subr.bf16.mxu0 %v1459_v27 }
  0xb1   : > { %1332 = vmatpush3.bf16.msra.mxu0 %v1459_v27 }
 0x134   : > { %v233_v28 = vpop.xlane.xlu0 %232 }
 0x135   : > { %v243_v29 = vmul.f32 0.0625, %v233_v28 }
 0x137   : > { %v247_v30 = vadd.f32 1e-05, %v243_v29 }
 0x138   : > { %v236_v31 = vpop.xlane.xlu1 %235  ;;  %v239_v32 = vpop.xlane.xlu0 %238 }
 0x139   : > { %1469 = vrsqrt.f32 %v247_v30  ;;  %v244_v33 = vmul.f32 0.0625, %v236_v31  ;;  %v245_v34 = vmul.f32 0.0625, %v239_v32 }
 0x13b   : > { %v248_v35 = vadd.f32 1e-05, %v244_v33  ;;  %v249_v36 = vadd.f32 1e-05, %v245_v34 }
 0x13c   : > { %v242_v37 = vpop.xlane.xlu1 %241 }
 0x13d   : > { %1471 = vrsqrt.f32 %v248_v35  ;;  %v246_v38 = vmul.f32 0.0625, %v242_v37 }
 0x13e   : > { %1473 = vrsqrt.f32 %v249_v36 }
 0x13f   : > { %v250_v39 = vadd.f32 1e-05, %v246_v38 }
 0x141   : > { %1475 = vrsqrt.f32 %v250_v39 }
 0x143   : > { %v1470_v40 = vpop.eup %1469 }
 0x144   : > { %v255_v42 = vmul.f32 %v1470_v40, %v223_v12 }
 0x146   : > { %v265_v44 = vmul.f32 %v1251_v41, %v255_v42 }
 0x147   : > { %v1472_v45 = vpop.eup %1471 }
 0x148   : > { %v1474_v46 = vpop.eup %1473  ;;  %v275_v47 = vadd.f32 %v1252_v43, %v265_v44  ;;  %v256_v48 = vmul.f32 %v1472_v45, %v224_v20 }
 0x149   : > { %v257_v49 = vmul.f32 %v1474_v46, %v225_v13 }
 0x14a   : > { %v266_v50 = vmul.f32 %v1251_v41, %v256_v48  ;;  %vm279_vm1 = vcmp.ge.f32.partialorder %v275_v47, 0.0  ;;  %v283_v51 = vmul.f32 0.01, %v275_v47 }
 0x14b   : > { %v1476_v52 = vpop.eup %1475  ;;  %v267_v53 = vmul.f32 %v1251_v41, %v257_v49 }
 0x14c   : > { %v276_v54 = vadd.f32 %v1252_v43, %v266_v50  ;;  %v258_v55 = vmul.f32 %v1476_v52, %v226_v21  ;;  %v287_v56 = vsel %vm279_vm1, %v275_v47, %v283_v51 }
 0x14d   : > { %v277_v57 = vadd.f32 %v1252_v43, %v267_v53  ;;  %v296_v58 = vrot.slane %v287_v56, 7 }
 0x14e   : > { %v268_v59 = vmul.f32 %v1251_v41, %v258_v55  ;;  %vm280_vm2 = vcmp.ge.f32.partialorder %v276_v54, 0.0  ;;  %v284_v60 = vmul.f32 0.01, %v276_v54 }
 0x14f   : > { %vm281_vm4 = vcmp.ge.f32.partialorder %v277_v57, 0.0  ;;  %v285_v61 = vmul.f32 0.01, %v277_v57  ;;  %v308_v7 = vsel %vm295_vm3, 0.0, %v296_v58 }
 0x150   : > { %v278_v62 = vadd.f32 %v1252_v43, %v268_v59  ;;  %v288_v63 = vsel %vm280_vm2, %v276_v54, %v284_v60  ;;  %v313_v12 = vrot.slane %v308_v7, 1  ;;  %v335_v30 = vrot.slane %v308_v7, 2 }
 0x151   : > { %v289_v4 = vsel %vm281_vm4, %v277_v57, %v285_v61  ;;  %v297_v6 = vrot.slane %v288_v63, 7 }
 0x152   : > { %v299_v8 = vrot.slane %v289_v4, 7  ;;  %vm282_vm5 = vcmp.ge.f32.partialorder %v278_v62, 0.0  ;;  %v286_v9 = vmul.f32 0.01, %v278_v62 }
 0x153   : > { %v298_v10 = vsel %vm295_vm3, %v296_v58, %v297_v6 }
 0x154   : > { %v300_v11 = vsel %vm295_vm3, %v297_v6, %v299_v8  ;;  %v314_v13 = vrot.slane %v298_v10, 1  ;;  %v290_v14 = vsel %vm282_vm5, %v278_v62, %v286_v9  ;;  %v336_v22 = vrot.slane %v298_v10, 2 }
 0x155   : > { %v316_v16 = vrot.slane %v300_v11, 1  ;;  %v301_v17 = vrot.slane %v290_v14, 7  ;;  %v338_v26 = vrot.slane %v300_v11, 2 }
 0x156   : > { %v315_v18 = vsel %vm312_vm6, %v313_v12, %v314_v13  ;;  %v337_v32 = vsel %vm334_vm7, %v335_v30, %v336_v22 }
 0x157   : > { %v317_v19 = vsel %vm312_vm6, %v314_v13, %v316_v16  ;;  %v302_v20 = vsel %vm295_vm3, %v299_v8, %v301_v17  ;;  %v309_v21 = vsel %vm295_vm3, %v301_v17, 0.0  ;;  %v339_v33 = vsel %vm334_vm7, %v336_v22, %v338_v26 }
 0x158   : > { %v1377_v23 = vpack.i.bf16 %v317_v19, %v315_v18  ;;  %v318_v24 = vrot.slane %v302_v20, 1  ;;  %v320_v25 = vrot.slane %v309_v21, 1  ;;  %v340_v34 = vrot.slane %v302_v20, 2 }
 0x159   : > { %v342_v35 = vrot.slane %v309_v21, 2  ;;  %v1387_v36 = vpack.i.bf16 %v339_v33, %v337_v32 }
 0x15a   : > { %1378 = vrot.lane.b32.xlu0 %v1377_v23, %s1509_s5  ;;  %v319_v28 = vsel %vm312_vm6, %v316_v16, %v318_v24  ;;  %v321_v29 = vsel %vm312_vm6, %v318_v24, %v320_v25  ;;  %v341_v37 = vsel %vm334_vm7, %v338_v26, %v340_v34 }
 0x15b   : > { %v1382_v31 = vpack.i.bf16 %v321_v29, %v319_v28  ;;  %v343_v38 = vsel %vm334_vm7, %v340_v34, %v342_v35 }
 0x15c   : > { %v1392_v39 = vpack.i.bf16 %v343_v38, %v341_v37 }
 0x15d   : > { %1383 = vrot.lane.b32.xlu1 %v1382_v31, %s1509_s5 }
 0x161   : > { %1388 = vrot.lane.b32.xlu1 %v1387_v36, %s1510_s6 }
 0x165   : > { %1393 = vrot.lane.b32.xlu1 %v1392_v39, %s1510_s6 }
 0x1cc   : > { %v1379_v40 = vpop.permute.xlu0 %1378 }
 0x1cd   : > { %v1381_v42 = vunpack.i.h.bf16 %v1379_v40  ;;  %v1380_v43 = vunpack.i.l.bf16 %v1379_v40 }
 0x1cf   : > { %v1384_v41 = vpop.permute.xlu1 %1383  ;;  %v356_v49 = vsel %vm205_vm0, %v308_v7, %v1380_v43  ;;  %v357_v50 = vsel %vm205_vm0, %v298_v10, %v1381_v42  ;;  %v1260_v43 = vld [vmem:[%s1845_s1 + $0x1] ss:$0 sm:$0xff] }
 0x1d0   : > { %v1386_v47 = vunpack.i.h.bf16 %v1384_v41  ;;  %v1385_v48 = vunpack.i.l.bf16 %v1384_v41 }
 0x1d2   : > { %v359_v57 = vsel %vm205_vm0, %v302_v20, %v1386_v47  ;;  %v358_v58 = vsel %vm205_vm0, %v300_v11, %v1385_v48 }
 0x1d3   : > { %v1389_v44 = vpop.permute.xlu1 %1388 }
 0x1d4   : > { %v1391_v45 = vunpack.i.h.bf16 %v1389_v44  ;;  %v1390_v46 = vunpack.i.l.bf16 %v1389_v44 }
 0x1d6   : > { %v361_v51 = vsel %vm360_vm8, %v356_v49, %v1390_v46  ;;  %v362_v52 = vsel %vm360_vm8, %v357_v50, %v1391_v45  ;;  %v1261_v46 = vld [vmem:[%s1846_s2 + $0x1] ss:$0 sm:$0xff] }
 0x1d7   : > { %v1394_v53 = vpop.permute.xlu1 %1393  ;;  %v365_v54 = vpack.c.bf16 %v362_v52, %v361_v51 }
 0x1d8   : > { %v1396_v55 = vunpack.i.h.bf16 %v1394_v53  ;;  %v1395_v56 = vunpack.i.l.bf16 %v1394_v53 }
 0x1d9   : > { %1333 = vmatprep.mubr.msk.bf16.mxu0 %vm391_vm9, %v365_v54 }
 0x1da   : > { %v363_v59 = vsel %vm360_vm8, %v358_v58, %v1395_v56  ;;  %v364_v60 = vsel %vm360_vm8, %v359_v57, %v1396_v55 }
 0x1db   : > { %v366_v61 = vpack.c.bf16 %v364_v60, %v363_v59 }
 0x1dd   : > { %1334 = vmatmul.mubr.msk.bf16.vlgmr.msra.gmra.mrb[0].mxu0 %vm391_vm9, %v366_v61 }
 0x2b0   : > { %v1335_v62 = vpop.f32.mrb[0].mxu0 }
 0x2b1   : > { %v432_v63 = vpop.f32.mrb[1].mxu0  ;;  %v1622_v7 = vadd.f32 %v1335_v62, %v1554_v1 }
 0x2b2   : > { %v1619_v3 = vadd.f32 %v432_v63, %v1552_v0  ;;  %v1336_v4 = vpop.f32.mrb[2].mxu0 }
 0x2b3   : > { %v435_v6 = vpop.f32.mrb[3].mxu0  ;;  %v1632_v11 = vadd.f32 %v1336_v4, %v1562_v5  ;;  %v461_v0 = vsel %vm205_vm0, %v1622_v7, 0.0 }
 0x2b4   : > { %v1625_v8 = vadd.f32 %v435_v6, %v1556_v2  ;;  %v455_v9 = vsel %vm205_vm0, %v1619_v3, 0.0 }
 0x2b5   : > { %456 = vadd.xlane.f32.xlu0 %v455_v9  ;;  %v464_v1 = vsel %vm205_vm0, %v1632_v11, 0.0 }
 0x2b6   : > { %v458_v10 = vsel %vm205_vm0, %v1625_v8, 0.0 }
 0x2b7   : > { %459 = vadd.xlane.f32.xlu1 %v458_v10 }
 0x2b9   : > { %462 = vadd.xlane.f32.xlu0 %v461_v0 }
 0x2bd   : > { %465 = vadd.xlane.f32.xlu0 %v464_v1 }
 0x342   : > { %v457_v2 = vpop.xlane.xlu0 %456 }
 0x343   : > { %v467_v12 = vmul.f32 0.0625, %v457_v2 }
 0x344   : > { %v460_v13 = vpop.xlane.xlu1 %459 }
 0x345   : > { %v471_v14 = vsub.f32 %v1619_v3, %v467_v12  ;;  %v468_v15 = vmul.f32 0.0625, %v460_v13 }
 0x346   : > { %v463_v16 = vpop.xlane.xlu0 %462 }
 0x347   : > { %v472_v17 = vsub.f32 %v1625_v8, %v468_v15  ;;  %v469_v18 = vmul.f32 0.0625, %v463_v16  ;;  %v475_v5 = vmul.f32 %v471_v14, %v471_v14 }
 0x349   : > { %v473_v19 = vsub.f32 %v1622_v7, %v469_v18  ;;  %v479_v20 = vsel %vm205_vm0, %v475_v5, 0.0  ;;  %v476_v21 = vmul.f32 %v472_v17, %v472_v17  ;;  %v1461_v5 = vld [vmem:[%s1847_s3 + $0x20] sm:$0xff]  }
 0x34a   : > { %480 = vadd.xlane.f32.xlu0 %v479_v20  ;;  %v466_v22 = vpop.xlane.xlu0 %465 }
 0x34b   : > { %v470_v23 = vmul.f32 0.0625, %v466_v22  ;;  %v482_v24 = vsel %vm205_vm0, %v476_v21, 0.0  ;;  %v477_v25 = vmul.f32 %v473_v19, %v473_v19 }
 0x34c   : > { %483 = vadd.xlane.f32.xlu1 %v482_v24 }
 0x34d   : > { %v474_v26 = vsub.f32 %v1632_v11, %v470_v23  ;;  %v485_v27 = vsel %vm205_vm0, %v477_v25, 0.0 }
 0x34e   : > { %486 = vadd.xlane.f32.xlu0 %v485_v27 }
 0x34f   : > { %v478_v28 = vmul.f32 %v474_v26, %v474_v26 }
 0x351   : > { %v488_v29 = vsel %vm205_vm0, %v478_v28, 0.0 }
 0x352   : > { %489 = vadd.xlane.f32.xlu1 %v488_v29 }
 0x3d7   : > { %v481_v30 = vpop.xlane.xlu0 %480 }
 0x3d8   : > { %v491_v31 = vmul.f32 0.0625, %v481_v30 }
 0x3d9   : > { %v484_v32 = vpop.xlane.xlu1 %483 }
 0x3da   : > { %v495_v33 = vadd.f32 1e-05, %v491_v31  ;;  %v492_v34 = vmul.f32 0.0625, %v484_v32  ;;  %v1462_v31 = vld [vmem:[%s1847_s3 + $0x28] sm:$0xff]  }
 0x3db   : > { %v487_v35 = vpop.xlane.xlu0 %486 }
 0x3dc   : > { %1477 = vrsqrt.f32 %v495_v33  ;;  %v496_v36 = vadd.f32 1e-05, %v492_v34  ;;  %v493_v37 = vmul.f32 0.0625, %v487_v35 }
 0x3de   : > { %1479 = vrsqrt.f32 %v496_v36  ;;  %v497_v38 = vadd.f32 1e-05, %v493_v37 }
 0x3df   : > { %v490_v39 = vpop.xlane.xlu1 %489 }
 0x3e0   : > { %1481 = vrsqrt.f32 %v497_v38  ;;  %v494_v40 = vmul.f32 0.0625, %v490_v39 }
 0x3e2   : > { %v498_v41 = vadd.f32 1e-05, %v494_v40 }
 0x3e4   : > { %1483 = vrsqrt.f32 %v498_v41 }
 0x3e6   : > { %v1478_v42 = vpop.eup %1477 }
 0x3e7   : > { %v503_v44 = vmul.f32 %v1478_v42, %v471_v14  ;;  %v1460_v14 = vld [vmem:[%s1847_s3 + $0x18] sm:$0xff]  }
 0x3e8   : > { %v1480_v45 = vpop.eup %1479  ;;  %1337 = vmatprep.subr.bf16.mxu1 %v1460_v14 }
 0x3e9   : > { %v513_v47 = vmul.f32 %v1260_v43, %v503_v44  ;;  %v504_v48 = vmul.f32 %v1480_v45, %v472_v17  ;;  %1338 = vmatpush3.bf16.msra.mxu1 %v1460_v14 }
 0x3ea   : > { %v1482_v49 = vpop.eup %1481  ;;  %1339 = vmatprep.subr.bf16.mxu1 %v1461_v5 }
 0x3eb   : > { %v523_v50 = vadd.f32 %v1261_v46, %v513_v47  ;;  %v514_v51 = vmul.f32 %v1260_v43, %v504_v48  ;;  %v505_v52 = vmul.f32 %v1482_v49, %v473_v19 }
 0x3ed   : > { %v524_v53 = vadd.f32 %v1261_v46, %v514_v51  ;;  %v515_v54 = vmul.f32 %v1260_v43, %v505_v52  ;;  %vm527_vm10 = vcmp.ge.f32.partialorder %v523_v50, 0.0  ;;  %v531_v55 = vmul.f32 0.01, %v523_v50  ;;  %1340 = vmatpush3.bf16.msra.mxu1 %v1461_v5 }
 0x3ee   : > { %v1484_v56 = vpop.eup %1483  ;;  %1341 = vmatprep.subr.bf16.mxu1 %v1462_v31 }
 0x3ef   : > { %v525_v57 = vadd.f32 %v1261_v46, %v515_v54  ;;  %v506_v58 = vmul.f32 %v1484_v56, %v474_v26  ;;  %vm528_vm11 = vcmp.ge.f32.partialorder %v524_v53, 0.0  ;;  %v532_v59 = vmul.f32 0.01, %v524_v53 }
 0x3f0   : > { %v535_v60 = vsel %vm527_vm10, %v523_v50, %v531_v55 }
 0x3f1   : > { %v516_v61 = vmul.f32 %v1260_v43, %v506_v58  ;;  %vm529_vm12 = vcmp.ge.f32.partialorder %v525_v57, 0.0  ;;  %v533_v62 = vmul.f32 0.01, %v525_v57  ;;  %v536_v63 = vsel %vm528_vm11, %v524_v53, %v532_v59  ;;  %1342 = vmatpush3.bf16.msra.mxu1 %v1462_v31 }
 0x3f2   : > { %v543_v4 = vrot.slane %v535_v60, 7  ;;  %v544_v6 = vrot.slane %v536_v63, 7 }
 0x3f3   : > { %v526_v9 = vadd.f32 %v1261_v46, %v516_v61  ;;  %v537_v10 = vsel %vm529_vm12, %v525_v57, %v533_v62 }
 0x3f4   : > { %v545_v0 = vsel %vm295_vm3, %v543_v4, %v544_v6  ;;  %v546_v1 = vrot.slane %v537_v10, 7  ;;  %v555_v2 = vsel %vm295_vm3, 0.0, %v543_v4 }
 0x3f5   : > { %v560_v12 = vrot.slane %v545_v0, 1  ;;  %vm530_vm13 = vcmp.ge.f32.partialorder %v526_v9, 0.0  ;;  %v534_v13 = vmul.f32 0.01, %v526_v9  ;;  %v559_v16 = vrot.slane %v555_v2, 1 }
 0x3f6   : > { %v547_v15 = vsel %vm295_vm3, %v544_v6, %v546_v1  ;;  %v581_v30 = vrot.slane %v545_v0, 2  ;;  %v580_v33 = vrot.slane %v555_v2, 2 }
 0x3f7   : > { %v562_v17 = vrot.slane %v547_v15, 1  ;;  %v538_v18 = vsel %vm530_vm13, %v526_v9, %v534_v13  ;;  %v561_v20 = vsel %vm312_vm6, %v559_v16, %v560_v12  ;;  %v583_v27 = vrot.slane %v547_v15, 2 }
 0x3f8   : > { %v548_v19 = vrot.slane %v538_v18, 7  ;;  %v582_v37 = vsel %vm334_vm7, %v580_v33, %v581_v30 }
 0x3f9   : > { %v563_v21 = vsel %vm312_vm6, %v560_v12, %v562_v17  ;;  %v584_v34 = vsel %vm334_vm7, %v581_v30, %v583_v27 }
 0x3fa   : > { %v1397_v22 = vpack.i.bf16 %v563_v21, %v561_v20  ;;  %v549_v23 = vsel %vm295_vm3, %v546_v1, %v548_v19  ;;  %v556_v24 = vsel %vm295_vm3, %v548_v19, 0.0  ;;  %v1407_v38 = vpack.i.bf16 %v584_v34, %v582_v37 }
 0x3fb   : > { %v564_v25 = vrot.slane %v549_v23, 1  ;;  %v566_v26 = vrot.slane %v556_v24, 1  ;;  %v585_v35 = vrot.slane %v549_v23, 2  ;;  %v587_v36 = vrot.slane %v556_v24, 2 }
 0x3fc   : > { %1398 = vrot.lane.b32.xlu0 %v1397_v22, %s1509_s5 }
 0x3fd   : > { %v565_v28 = vsel %vm312_vm6, %v562_v17, %v564_v25  ;;  %v567_v29 = vsel %vm312_vm6, %v564_v25, %v566_v26  ;;  %v586_v39 = vsel %vm334_vm7, %v583_v27, %v585_v35  ;;  %v588_v40 = vsel %vm334_vm7, %v585_v35, %v587_v36 }
 0x3fe   : > { %v1402_v32 = vpack.i.bf16 %v567_v29, %v565_v28  ;;  %v1412_v41 = vpack.i.bf16 %v588_v40, %v586_v39 }
 0x400   : > { %1403 = vrot.lane.b32.xlu1 %v1402_v32, %s1509_s5 }
 0x404   : > { %1408 = vrot.lane.b32.xlu1 %v1407_v38, %s1510_s6 }
 0x408   : > { %1413 = vrot.lane.b32.xlu1 %v1412_v41, %s1510_s6 }
 0x46e   : > { %v1399_v42 = vpop.permute.xlu0 %1398 }
 0x46f   : > { %v1401_v44 = vunpack.i.h.bf16 %v1399_v42  ;;  %v1400_v45 = vunpack.i.l.bf16 %v1399_v42 }
 0x471   : > { %v601_v51 = vsel %vm205_vm0, %v555_v2, %v1400_v45  ;;  %v602_v52 = vsel %vm205_vm0, %v545_v0, %v1401_v44  ;;  %v1275_v45 = vld [vmem:[%s1845_s1 + $0x2] ss:$0 sm:$0xff] }
 0x472   : > { %v1404_v43 = vpop.permute.xlu1 %1403 }
 0x473   : > { %v1406_v49 = vunpack.i.h.bf16 %v1404_v43  ;;  %v1405_v50 = vunpack.i.l.bf16 %v1404_v43 }
 0x475   : > { %v604_v59 = vsel %vm205_vm0, %v549_v23, %v1406_v49  ;;  %v603_v60 = vsel %vm205_vm0, %v547_v15, %v1405_v50 }
 0x476   : > { %v1409_v46 = vpop.permute.xlu1 %1408 }
 0x477   : > { %v1411_v47 = vunpack.i.h.bf16 %v1409_v46  ;;  %v1410_v48 = vunpack.i.l.bf16 %v1409_v46 }
 0x479   : > { %v605_v53 = vsel %vm360_vm8, %v601_v51, %v1410_v48  ;;  %v606_v54 = vsel %vm360_vm8, %v602_v52, %v1411_v47  ;;  %v1276_v48 = vld [vmem:[%s1846_s2 + $0x2] ss:$0 sm:$0xff] }
 0x47a   : > { %v1414_v55 = vpop.permute.xlu1 %1413  ;;  %v609_v56 = vpack.c.bf16 %v606_v54, %v605_v53 }
 0x47b   : > { %v1416_v57 = vunpack.i.h.bf16 %v1414_v55  ;;  %v1415_v58 = vunpack.i.l.bf16 %v1414_v55 }
 0x47c   : > { %1343 = vmatprep.mubr.msk.bf16.mxu1 %vm391_vm9, %v609_v56 }
 0x47d   : > { %v607_v61 = vsel %vm360_vm8, %v603_v60, %v1415_v58  ;;  %v608_v62 = vsel %vm360_vm8, %v604_v59, %v1416_v57 }
 0x47e   : > { %v610_v63 = vpack.c.bf16 %v608_v62, %v607_v61 }
 0x480   : > { %1344 = vmatmul.mubr.msk.bf16.vlgmr.msra.gmra.mrb[0].mxu1 %vm391_vm9, %v610_v63 }
 0x553   : > { %v1345_v4 = vpop.f32.mrb[0].mxu1 }
 0x554   : > { %v676_v6 = vpop.f32.mrb[1].mxu1  ;;  %v1692_v1 = vadd.f32 %v1345_v4, %v1622_v7 }
 0x555   : > { %v1689_v9 = vadd.f32 %v676_v6, %v1619_v3  ;;  %v1346_v10 = vpop.f32.mrb[2].mxu1 }
 0x556   : > { %v679_v0 = vpop.f32.mrb[3].mxu1  ;;  %v1702_v14 = vadd.f32 %v1346_v10, %v1632_v11  ;;  %v705_v3 = vsel %vm205_vm0, %v1692_v1, 0.0 }
 0x557   : > { %v1695_v2 = vadd.f32 %v679_v0, %v1625_v8  ;;  %v699_v12 = vsel %vm205_vm0, %v1689_v9, 0.0 }
 0x558   : > { %700 = vadd.xlane.f32.xlu0 %v699_v12  ;;  %v708_v7 = vsel %vm205_vm0, %v1702_v14, 0.0 }
 0x559   : > { %v702_v13 = vsel %vm205_vm0, %v1695_v2, 0.0 }
 0x55a   : > { %703 = vadd.xlane.f32.xlu1 %v702_v13 }
 0x55c   : > { %706 = vadd.xlane.f32.xlu0 %v705_v3 }
 0x560   : > { %709 = vadd.xlane.f32.xlu0 %v708_v7 }
 0x5e5   : > { %v701_v8 = vpop.xlane.xlu0 %700 }
 0x5e6   : > { %v711_v15 = vmul.f32 0.0625, %v701_v8 }
 0x5e7   : > { %v704_v16 = vpop.xlane.xlu1 %703 }
 0x5e8   : > { %v715_v17 = vsub.f32 %v1689_v9, %v711_v15  ;;  %v712_v18 = vmul.f32 0.0625, %v704_v16 }
 0x5e9   : > { %v707_v5 = vpop.xlane.xlu0 %706 }
 0x5ea   : > { %v716_v19 = vsub.f32 %v1695_v2, %v712_v18  ;;  %v713_v20 = vmul.f32 0.0625, %v707_v5  ;;  %v719_v11 = vmul.f32 %v715_v17, %v715_v17 }
 0x5ec   : > { %v717_v21 = vsub.f32 %v1692_v1, %v713_v20  ;;  %v723_v22 = vsel %vm205_vm0, %v719_v11, 0.0  ;;  %v720_v23 = vmul.f32 %v716_v19, %v716_v19 }
 0x5ed   : > { %724 = vadd.xlane.f32.xlu0 %v723_v22  ;;  %v710_v24 = vpop.xlane.xlu0 %709 }
 0x5ee   : > { %v714_v25 = vmul.f32 0.0625, %v710_v24  ;;  %v726_v26 = vsel %vm205_vm0, %v720_v23, 0.0  ;;  %v721_v27 = vmul.f32 %v717_v21, %v717_v21  ;;  %v1464_v23 = vld [vmem:[%s1847_s3 + $0x38] sm:$0xff]  }
 0x5ef   : > { %727 = vadd.xlane.f32.xlu1 %v726_v26 }
 0x5f0   : > { %v718_v28 = vsub.f32 %v1702_v14, %v714_v25  ;;  %v729_v29 = vsel %vm205_vm0, %v721_v27, 0.0 }
 0x5f1   : > { %730 = vadd.xlane.f32.xlu0 %v729_v29 }
 0x5f2   : > { %v722_v30 = vmul.f32 %v718_v28, %v718_v28 }
 0x5f4   : > { %v732_v31 = vsel %vm205_vm0, %v722_v30, 0.0 }
 0x5f5   : > { %733 = vadd.xlane.f32.xlu1 %v732_v31 }
 0x67a   : > { %v725_v32 = vpop.xlane.xlu0 %724 }
 0x67b   : > { %v735_v33 = vmul.f32 0.0625, %v725_v32 }
 0x67c   : > { %v728_v34 = vpop.xlane.xlu1 %727 }
 0x67d   : > { %v739_v35 = vadd.f32 1e-05, %v735_v33  ;;  %v736_v36 = vmul.f32 0.0625, %v728_v34  ;;  %v1465_v33 = vld [vmem:[%s1847_s3 + $0x40] sm:$0xff]  }
 0x67e   : > { %v731_v37 = vpop.xlane.xlu0 %730 }
 0x67f   : > { %1485 = vrsqrt.f32 %v739_v35  ;;  %v740_v38 = vadd.f32 1e-05, %v736_v36  ;;  %v737_v39 = vmul.f32 0.0625, %v731_v37 }
 0x681   : > { %1487 = vrsqrt.f32 %v740_v38  ;;  %v741_v40 = vadd.f32 1e-05, %v737_v39 }
 0x682   : > { %v734_v41 = vpop.xlane.xlu1 %733 }
 0x683   : > { %1489 = vrsqrt.f32 %v741_v40  ;;  %v738_v42 = vmul.f32 0.0625, %v734_v41 }
 0x685   : > { %v742_v43 = vadd.f32 1e-05, %v738_v42 }
 0x687   : > { %1491 = vrsqrt.f32 %v742_v43 }
 0x689   : > { %v1486_v44 = vpop.eup %1485 }
 0x68a   : > { %v747_v46 = vmul.f32 %v1486_v44, %v715_v17  ;;  %v1463_v17 = vld [vmem:[%s1847_s3 + $0x30] sm:$0xff]  }
 0x68b   : > { %v1488_v47 = vpop.eup %1487  ;;  %1347 = vmatprep.subr.bf16.mxu0 %v1463_v17 }
 0x68c   : > { %v757_v49 = vmul.f32 %v1275_v45, %v747_v46  ;;  %v748_v50 = vmul.f32 %v1488_v47, %v716_v19  ;;  %1348 = vmatpush3.bf16.msra.mxu0 %v1463_v17 }
 0x68d   : > { %v1490_v51 = vpop.eup %1489  ;;  %1349 = vmatprep.subr.bf16.mxu0 %v1464_v23 }
 0x68e   : > { %v767_v52 = vadd.f32 %v1276_v48, %v757_v49  ;;  %v758_v53 = vmul.f32 %v1275_v45, %v748_v50  ;;  %v749_v54 = vmul.f32 %v1490_v51, %v717_v21 }
 0x690   : > { %v768_v55 = vadd.f32 %v1276_v48, %v758_v53  ;;  %v759_v56 = vmul.f32 %v1275_v45, %v749_v54  ;;  %vm771_vm14 = vcmp.ge.f32.partialorder %v767_v52, 0.0  ;;  %v775_v57 = vmul.f32 0.01, %v767_v52  ;;  %1350 = vmatpush3.bf16.msra.mxu0 %v1464_v23 }
 0x691   : > { %v1492_v58 = vpop.eup %1491  ;;  %1351 = vmatprep.subr.bf16.mxu0 %v1465_v33 }
 0x692   : > { %v769_v59 = vadd.f32 %v1276_v48, %v759_v56  ;;  %v750_v60 = vmul.f32 %v1492_v58, %v718_v28  ;;  %vm772_vm15 = vcmp.ge.f32.partialorder %v768_v55, 0.0  ;;  %v776_v61 = vmul.f32 0.01, %v768_v55 }
 0x693   : > { %v779_v62 = vsel %vm771_vm14, %v767_v52, %v775_v57 }
 0x694   : > { %v760_v63 = vmul.f32 %v1275_v45, %v750_v60  ;;  %vm773_vm1 = vcmp.ge.f32.partialorder %v769_v59, 0.0  ;;  %v777_v4 = vmul.f32 0.01, %v769_v59  ;;  %v780_v6 = vsel %vm772_vm15, %v768_v55, %v776_v61  ;;  %1352 = vmatpush3.bf16.msra.mxu0 %v1465_v33 }
 0x695   : > { %v787_v10 = vrot.slane %v779_v62, 7  ;;  %v788_v0 = vrot.slane %v780_v6, 7 }
 0x696   : > { %v770_v12 = vadd.f32 %v1276_v48, %v760_v63  ;;  %v781_v13 = vsel %vm773_vm1, %v769_v59, %v777_v4 }
 0x697   : > { %v789_v3 = vsel %vm295_vm3, %v787_v10, %v788_v0  ;;  %v790_v7 = vrot.slane %v781_v13, 7  ;;  %v799_v8 = vsel %vm295_vm3, 0.0, %v787_v10 }
 0x698   : > { %v804_v15 = vrot.slane %v789_v3, 1  ;;  %vm774_vm2 = vcmp.ge.f32.partialorder %v770_v12, 0.0  ;;  %v778_v16 = vmul.f32 0.01, %v770_v12  ;;  %v803_v5 = vrot.slane %v799_v8, 1 }
 0x699   : > { %v791_v18 = vsel %vm295_vm3, %v788_v0, %v790_v7  ;;  %v825_v32 = vrot.slane %v789_v3, 2  ;;  %v824_v35 = vrot.slane %v799_v8, 2 }
 0x69a   : > { %v806_v19 = vrot.slane %v791_v18, 1  ;;  %v782_v20 = vsel %vm774_vm2, %v770_v12, %v778_v16  ;;  %v805_v21 = vsel %vm312_vm6, %v803_v5, %v804_v15  ;;  %v827_v29 = vrot.slane %v791_v18, 2 }
 0x69b   : > { %v792_v11 = vrot.slane %v782_v20, 7  ;;  %v826_v39 = vsel %vm334_vm7, %v824_v35, %v825_v32 }
 0x69c   : > { %v807_v22 = vsel %vm312_vm6, %v804_v15, %v806_v19  ;;  %v828_v36 = vsel %vm334_vm7, %v825_v32, %v827_v29 }
 0x69d   : > { %v1417_v24 = vpack.i.bf16 %v807_v22, %v805_v21  ;;  %v793_v25 = vsel %vm295_vm3, %v790_v7, %v792_v11  ;;  %v800_v26 = vsel %vm295_vm3, %v792_v11, 0.0  ;;  %v1427_v40 = vpack.i.bf16 %v828_v36, %v826_v39 }
 0x69e   : > { %v808_v27 = vrot.slane %v793_v25, 1  ;;  %v810_v28 = vrot.slane %v800_v26, 1  ;;  %v829_v37 = vrot.slane %v793_v25, 2  ;;  %v831_v38 = vrot.slane %v800_v26, 2 }
 0x69f   : > { %1418 = vrot.lane.b32.xlu0 %v1417_v24, %s1509_s5 }
 0x6a0   : > { %v809_v30 = vsel %vm312_vm6, %v806_v19, %v808_v27  ;;  %v811_v31 = vsel %vm312_vm6, %v808_v27, %v810_v28  ;;  %v830_v41 = vsel %vm334_vm7, %v827_v29, %v829_v37  ;;  %v832_v42 = vsel %vm334_vm7, %v829_v37, %v831_v38 }
 0x6a1   : > { %v1422_v34 = vpack.i.bf16 %v811_v31, %v809_v30  ;;  %v1432_v43 = vpack.i.bf16 %v832_v42, %v830_v41 }
 0x6a3   : > { %1423 = vrot.lane.b32.xlu1 %v1422_v34, %s1509_s5 }
 0x6a7   : > { %1428 = vrot.lane.b32.xlu1 %v1427_v40, %s1510_s6 }
 0x6ab   : > { %1433 = vrot.lane.b32.xlu1 %v1432_v43, %s1510_s6 }
 0x711   : > { %v1419_v44 = vpop.permute.xlu0 %1418 }
 0x712   : > { %v1421_v46 = vunpack.i.h.bf16 %v1419_v44  ;;  %v1420_v47 = vunpack.i.l.bf16 %v1419_v44 }
 0x714   : > { %v846_v51 = vsel %vm205_vm0, %v789_v3, %v1421_v46  ;;  %v845_v52 = vsel %vm205_vm0, %v799_v8, %v1420_v47  ;;  %v1290_v47 = vld [vmem:[%s1845_s1 + $0x3] ss:$0 sm:$0xff] }
 0x715   : > { %v1424_v45 = vpop.permute.xlu1 %1423 }
 0x716   : > { %v1426_v53 = vunpack.i.h.bf16 %v1424_v45  ;;  %v1425_v54 = vunpack.i.l.bf16 %v1424_v45 }
 0x718   : > { %v848_v61 = vsel %vm205_vm0, %v793_v25, %v1426_v53  ;;  %v847_v62 = vsel %vm205_vm0, %v791_v18, %v1425_v54 }
 0x719   : > { %v1429_v48 = vpop.permute.xlu1 %1428 }
 0x71a   : > { %v1431_v49 = vunpack.i.h.bf16 %v1429_v48  ;;  %v1430_v50 = vunpack.i.l.bf16 %v1429_v48 }
 0x71c   : > { %v850_v55 = vsel %vm360_vm8, %v846_v51, %v1431_v49  ;;  %v849_v56 = vsel %vm360_vm8, %v845_v52, %v1430_v50  ;;  %v1291_v50 = vld [vmem:[%s1846_s2 + $0x3] ss:$0 sm:$0xff] }
 0x71d   : > { %v853_v57 = vpack.c.bf16 %v850_v55, %v849_v56  ;;  %v1434_v58 = vpop.permute.xlu1 %1433 }
 0x71e   : > { %v1436_v59 = vunpack.i.h.bf16 %v1434_v58  ;;  %v1435_v60 = vunpack.i.l.bf16 %v1434_v58 }
 0x71f   : > { %1353 = vmatprep.mubr.msk.bf16.mxu0 %vm391_vm9, %v853_v57 }
 0x720   : > { %v851_v63 = vsel %vm360_vm8, %v847_v62, %v1435_v60  ;;  %v852_v4 = vsel %vm360_vm8, %v848_v61, %v1436_v59 }
 0x721   : > { %v854_v6 = vpack.c.bf16 %v852_v4, %v851_v63 }
 0x723   : > { %1354 = vmatmul.mubr.msk.bf16.vlgmr.msra.gmra.mrb[4].mxu0 %vm391_vm9, %v854_v6 }
 0x7f6   : > { %v1355_v10 = vpop.f32.mrb[4].mxu0 }
 0x7f7   : > { %v920_v0 = vpop.f32.mrb[5].mxu0  ;;  %v1762_v7 = vadd.f32 %v1355_v10, %v1692_v1 }
 0x7f8   : > { %v1759_v12 = vadd.f32 %v920_v0, %v1689_v9  ;;  %v1356_v13 = vpop.f32.mrb[6].mxu0 }
 0x7f9   : > { %v923_v3 = vpop.f32.mrb[7].mxu0  ;;  %v1772_v17 = vadd.f32 %v1356_v13, %v1702_v14  ;;  %v949_v9 = vsel %vm205_vm0, %v1762_v7, 0.0 }
 0x7fa   : > { %v1765_v8 = vadd.f32 %v923_v3, %v1695_v2  ;;  %v943_v15 = vsel %vm205_vm0, %v1759_v12, 0.0 }
 0x7fb   : > { %944 = vadd.xlane.f32.xlu0 %v943_v15  ;;  %v952_v1 = vsel %vm205_vm0, %v1772_v17, 0.0 }
 0x7fc   : > { %v946_v16 = vsel %vm205_vm0, %v1765_v8, 0.0 }
 0x7fd   : > { %947 = vadd.xlane.f32.xlu1 %v946_v16 }
 0x7ff   : > { %950 = vadd.xlane.f32.xlu0 %v949_v9 }
 0x803   : > { %953 = vadd.xlane.f32.xlu0 %v952_v1 }
 0x888   : > { %v945_v2 = vpop.xlane.xlu0 %944 }
 0x889   : > { %v955_v18 = vmul.f32 0.0625, %v945_v2 }
 0x88a   : > { %v948_v5 = vpop.xlane.xlu1 %947 }
 0x88b   : > { %v959_v19 = vsub.f32 %v1759_v12, %v955_v18  ;;  %v956_v20 = vmul.f32 0.0625, %v948_v5 }
 0x88c   : > { %v951_v11 = vpop.xlane.xlu0 %950 }
 0x88d   : > { %v960_v21 = vsub.f32 %v1765_v8, %v956_v20  ;;  %v957_v22 = vmul.f32 0.0625, %v951_v11  ;;  %v963_v14 = vmul.f32 %v959_v19, %v959_v19 }
 0x88f   : > { %v961_v23 = vsub.f32 %v1762_v7, %v957_v22  ;;  %v967_v24 = vsel %vm205_vm0, %v963_v14, 0.0  ;;  %v964_v25 = vmul.f32 %v960_v21, %v960_v21 }
 0x890   : > { %968 = vadd.xlane.f32.xlu0 %v967_v24  ;;  %v954_v26 = vpop.xlane.xlu0 %953 }
 0x891   : > { %v958_v27 = vmul.f32 0.0625, %v954_v26  ;;  %v970_v28 = vsel %vm205_vm0, %v964_v25, 0.0  ;;  %v965_v29 = vmul.f32 %v961_v23, %v961_v23  ;;  %v1467_v25 = vld [vmem:[%s1847_s3 + $0x50] sm:$0xff]  }
 0x892   : > { %971 = vadd.xlane.f32.xlu1 %v970_v28 }
 0x893   : > { %v962_v30 = vsub.f32 %v1772_v17, %v958_v27  ;;  %v973_v31 = vsel %vm205_vm0, %v965_v29, 0.0 }
 0x894   : > { %974 = vadd.xlane.f32.xlu0 %v973_v31 }
 0x895   : > { %v966_v32 = vmul.f32 %v962_v30, %v962_v30 }
 0x897   : > { %v976_v33 = vsel %vm205_vm0, %v966_v32, 0.0 }
 0x898   : > { %977 = vadd.xlane.f32.xlu1 %v976_v33 }
 0x91d   : > { %v969_v34 = vpop.xlane.xlu0 %968 }
 0x91e   : > { %v979_v35 = vmul.f32 0.0625, %v969_v34 }
 0x91f   : > { %v972_v36 = vpop.xlane.xlu1 %971 }
 0x920   : > { %v983_v37 = vadd.f32 1e-05, %v979_v35  ;;  %v980_v38 = vmul.f32 0.0625, %v972_v36  ;;  %v1468_v35 = vld [vmem:[%s1847_s3 + $0x58] sm:$0xff]  }
 0x921   : > { %v975_v39 = vpop.xlane.xlu0 %974 }
 0x922   : > { %1493 = vrsqrt.f32 %v983_v37  ;;  %v984_v40 = vadd.f32 1e-05, %v980_v38  ;;  %v981_v41 = vmul.f32 0.0625, %v975_v39 }
 0x924   : > { %1495 = vrsqrt.f32 %v984_v40  ;;  %v985_v42 = vadd.f32 1e-05, %v981_v41 }
 0x925   : > { %v978_v43 = vpop.xlane.xlu1 %977 }
 0x926   : > { %1497 = vrsqrt.f32 %v985_v42  ;;  %v982_v44 = vmul.f32 0.0625, %v978_v43 }
 0x928   : > { %v986_v45 = vadd.f32 1e-05, %v982_v44 }
 0x92a   : > { %1499 = vrsqrt.f32 %v986_v45 }
 0x92c   : > { %v1494_v46 = vpop.eup %1493 }
 0x92d   : > { %v991_v48 = vmul.f32 %v1494_v46, %v959_v19  ;;  %v1466_v19 = vld [vmem:[%s1847_s3 + $0x48] sm:$0xff]  }
 0x92e   : > { %v1496_v49 = vpop.eup %1495  ;;  %1357 = vmatprep.subr.bf16.mxu1 %v1466_v19 }
 0x92f   : > { %v1001_v51 = vmul.f32 %v1290_v47, %v991_v48  ;;  %v992_v52 = vmul.f32 %v1496_v49, %v960_v21  ;;  %1358 = vmatpush3.bf16.msra.mxu1 %v1466_v19 }
 0x930   : > { %v1498_v53 = vpop.eup %1497  ;;  %1359 = vmatprep.subr.bf16.mxu1 %v1467_v25 }
 0x931   : > { %v1011_v54 = vadd.f32 %v1291_v50, %v1001_v51  ;;  %v1002_v55 = vmul.f32 %v1290_v47, %v992_v52  ;;  %v993_v56 = vmul.f32 %v1498_v53, %v961_v23 }
 0x933   : > { %v1012_v57 = vadd.f32 %v1291_v50, %v1002_v55  ;;  %v1003_v58 = vmul.f32 %v1290_v47, %v993_v56  ;;  %vm1015_vm4 = vcmp.ge.f32.partialorder %v1011_v54, 0.0  ;;  %v1019_v59 = vmul.f32 0.01, %v1011_v54  ;;  %1360 = vmatpush3.bf16.msra.mxu1 %v1467_v25 }
 0x934   : > { %v1500_v60 = vpop.eup %1499  ;;  %1361 = vmatprep.subr.bf16.mxu1 %v1468_v35 }
 0x935   : > { %v1013_v61 = vadd.f32 %v1291_v50, %v1003_v58  ;;  %v994_v62 = vmul.f32 %v1500_v60, %v962_v30  ;;  %vm1016_vm5 = vcmp.ge.f32.partialorder %v1012_v57, 0.0  ;;  %v1020_v63 = vmul.f32 0.01, %v1012_v57 }
 0x936   : > { %v1023_v4 = vsel %vm1015_vm4, %v1011_v54, %v1019_v59 }
 0x937   : > { %v1004_v6 = vmul.f32 %v1290_v47, %v994_v62  ;;  %vm1017_vm10 = vcmp.ge.f32.partialorder %v1013_v61, 0.0  ;;  %v1021_v10 = vmul.f32 0.01, %v1013_v61  ;;  %v1024_v0 = vsel %vm1016_vm5, %v1012_v57, %v1020_v63  ;;  %1362 = vmatpush3.bf16.msra.mxu1 %v1468_v35 }
 0x938   : > { %v1031_v13 = vrot.slane %v1023_v4, 7  ;;  %v1032_v3 = vrot.slane %v1024_v0, 7 }
 0x939   : > { %v1014_v15 = vadd.f32 %v1291_v50, %v1004_v6  ;;  %v1025_v16 = vsel %vm1017_vm10, %v1013_v61, %v1021_v10 }
 0x93a   : > { %v1033_v9 = vsel %vm295_vm3, %v1031_v13, %v1032_v3  ;;  %v1034_v1 = vrot.slane %v1025_v16, 7  ;;  %v1043_v2 = vsel %vm295_vm3, 0.0, %v1031_v13 }
 0x93b   : > { %v1048_v18 = vrot.slane %v1033_v9, 1  ;;  %vm1018_vm11 = vcmp.ge.f32.partialorder %v1014_v15, 0.0  ;;  %v1022_v5 = vmul.f32 0.01, %v1014_v15  ;;  %v1047_v11 = vrot.slane %v1043_v2, 1 }
 0x93c   : > { %v1035_v20 = vsel %vm295_vm3, %v1032_v3, %v1034_v1  ;;  %v1069_v34 = vrot.slane %v1033_v9, 2  ;;  %v1068_v37 = vrot.slane %v1043_v2, 2 }
 0x93d   : > { %v1050_v21 = vrot.slane %v1035_v20, 1  ;;  %v1026_v22 = vsel %vm1018_vm11, %v1014_v15, %v1022_v5  ;;  %v1049_v23 = vsel %vm312_vm6, %v1047_v11, %v1048_v18  ;;  %v1071_v31 = vrot.slane %v1035_v20, 2 }
 0x93e   : > { %v1036_v14 = vrot.slane %v1026_v22, 7  ;;  %v1070_v41 = vsel %vm334_vm7, %v1068_v37, %v1069_v34 }
 0x93f   : > { %v1051_v24 = vsel %vm312_vm6, %v1048_v18, %v1050_v21  ;;  %v1072_v38 = vsel %vm334_vm7, %v1069_v34, %v1071_v31 }
 0x940   : > { %v1437_v26 = vpack.i.bf16 %v1051_v24, %v1049_v23  ;;  %v1037_v27 = vsel %vm295_vm3, %v1034_v1, %v1036_v14  ;;  %v1044_v28 = vsel %vm295_vm3, %v1036_v14, 0.0  ;;  %v1447_v42 = vpack.i.bf16 %v1072_v38, %v1070_v41 }
 0x941   : > { %v1052_v29 = vrot.slane %v1037_v27, 1  ;;  %v1054_v30 = vrot.slane %v1044_v28, 1  ;;  %v1073_v39 = vrot.slane %v1037_v27, 2  ;;  %v1075_v40 = vrot.slane %v1044_v28, 2 }
 0x942   : > { %1438 = vrot.lane.b32.xlu0 %v1437_v26, %s1509_s5 }
 0x943   : > { %v1053_v32 = vsel %vm312_vm6, %v1050_v21, %v1052_v29  ;;  %v1055_v33 = vsel %vm312_vm6, %v1052_v29, %v1054_v30  ;;  %v1074_v43 = vsel %vm334_vm7, %v1071_v31, %v1073_v39  ;;  %v1076_v44 = vsel %vm334_vm7, %v1073_v39, %v1075_v40 }
 0x944   : > { %v1442_v36 = vpack.i.bf16 %v1055_v33, %v1053_v32  ;;  %v1452_v45 = vpack.i.bf16 %v1076_v44, %v1074_v43 }
 0x946   : > { %1443 = vrot.lane.b32.xlu1 %v1442_v36, %s1509_s5 }
 0x94a   : > { %1448 = vrot.lane.b32.xlu1 %v1447_v42, %s1510_s6 }
 0x94e   : > { %1453 = vrot.lane.b32.xlu1 %v1452_v45, %s1510_s6 }
 0x9b4   : > { %v1439_v46 = vpop.permute.xlu0 %1438 }
 0x9b5   : > { %v1441_v48 = vunpack.i.h.bf16 %v1439_v46  ;;  %v1440_v49 = vunpack.i.l.bf16 %v1439_v46 }
 0x9b7   : > { %v1090_v53 = vsel %vm205_vm0, %v1033_v9, %v1441_v48  ;;  %v1089_v54 = vsel %vm205_vm0, %v1043_v2, %v1440_v49 }
 0x9b8   : > { %v1444_v47 = vpop.permute.xlu1 %1443 }
 0x9b9   : > { %v1446_v55 = vunpack.i.h.bf16 %v1444_v47  ;;  %v1445_v56 = vunpack.i.l.bf16 %v1444_v47 }
 0x9bb   : > { %v1092_v63 = vsel %vm205_vm0, %v1037_v27, %v1446_v55  ;;  %v1091_v4 = vsel %vm205_vm0, %v1035_v20, %v1445_v56 }
 0x9bc   : > { %v1449_v50 = vpop.permute.xlu1 %1448 }
 0x9bd   : > { %v1451_v51 = vunpack.i.h.bf16 %v1449_v50  ;;  %v1450_v52 = vunpack.i.l.bf16 %v1449_v50 }
 0x9bf   : > { %v1094_v57 = vsel %vm360_vm8, %v1090_v53, %v1451_v51  ;;  %v1093_v58 = vsel %vm360_vm8, %v1089_v54, %v1450_v52 }
 0x9c0   : > { %v1097_v59 = vpack.c.bf16 %v1094_v57, %v1093_v58  ;;  %v1454_v60 = vpop.permute.xlu1 %1453 }
 0x9c1   : > { %v1456_v61 = vunpack.i.h.bf16 %v1454_v60  ;;  %v1455_v62 = vunpack.i.l.bf16 %v1454_v60 }
 0x9c2   : > { %1363 = vmatprep.mubr.msk.bf16.mxu1 %vm391_vm9, %v1097_v59 }
 0x9c3   : > { %v1095_v6 = vsel %vm360_vm8, %v1091_v4, %v1455_v62  ;;  %v1096_v10 = vsel %vm360_vm8, %v1092_v63, %v1456_v61 }
 0x9c4   : > { %v1098_v0 = vpack.c.bf16 %v1096_v10, %v1095_v6 }
 0x9c6   : > { %1364 = vmatmul.mubr.msk.bf16.vlgmr.msra.gmra.mrb[4].mxu1 %vm391_vm9, %v1098_v0 }
 0xa99   : > { %v1365_v13 = vpop.f32.mrb[4].mxu1 }
 0xa9a   : > { %v1181_v3 = vadd.f32 %v1365_v13, %v1762_v7  ;;  %v1164_v15 = vpop.f32.mrb[5].mxu1 }
 0xa9b   : > { %v1179_v16 = vadd.f32 %v1164_v15, %v1759_v12  ;;  %v1366_v9 = vpop.f32.mrb[6].mxu1 }
 0xa9c   : > { %1185 = vst.msk [vmem:[%s197_s19 + $0x10] sm:$0xff] %vm205_vm0, %v1181_v3  ;;  %v1182_v1 = vadd.f32 %v1366_v9, %v1772_v17  ;;  %v1167_v2 = vpop.f32.mrb[7].mxu1 }
 0xa9d   : > { %1183 = vst.msk [vmem:[%s197_s19] sm:$0xff] %vm205_vm0, %v1179_v16  ;;  %v1180_v18 = vadd.f32 %v1167_v2, %v1765_v8 }
 0xa9e   : > { %1186 = vst.msk [vmem:[%s197_s19 + $0x18] sm:$0xff] %vm205_vm0, %v1182_v1 }
 0xa9f   : > { %1184 = vst.msk [vmem:[%s197_s19 + $0x8] sm:$0xff] %vm205_vm0, %v1180_v18 }
 0xaa0 PF: > { %s14_s15 = sadd.s32 1, %s1507_s15  }
 0xaa1   : > { %p11_p4 = scmp.ge.s32.totalorder %s14_s15, 4  }
 0xaa3   :  { %13 = sbr.rel (!%p11_p4) target bundleno = 1 (0x1), region = 75 }

</bundles_post_ra>
